<compile_context>
chip_gen: v7x
topology: tpu7x:2x2x1
jax: 0.10.0
libtpu: 0.0.40
codegen_flags: <defaults>
</compile_context>

<pallas_src>
import functools

import jax
import jax.numpy as jnp
import numpy as np
from jax.experimental import pallas as pl
from jax.experimental.pallas import tpu as pltpu


def _blend_kernel(dists_ref, zbuf_ref, pix_ref, pts_ref, out_ref, *,
                  neg_inv_sigma, inv_gamma, z_scale, zfar, K):
    eps = 1e-10
    mask = (pix_ref[...] >= 0).astype(jnp.float32)                  # (K, T)
    prob = jax.nn.sigmoid(dists_ref[...] * neg_inv_sigma) * mask    # (K, T)

    # alpha = prod_k (1 - prob_k): unrolled product of full-lane (1, T) rows
    # (K-1 plain VPU multiplies, no cross-lane traffic).
    one_minus = 1.0 - prob
    alpha = one_minus[0:1, :]
    for k in range(1, K):
        alpha = alpha * one_minus[k:k + 1, :]                       # (1, T)

    z_inv = (zfar - zbuf_ref[...]) * z_scale * mask                 # (K, T)
    z_inv_max = jnp.maximum(jnp.max(z_inv, axis=0, keepdims=True), eps)
    w = prob * jnp.exp((z_inv - z_inv_max) * inv_gamma)             # (K, T)
    denom = jnp.sum(w, axis=0, keepdims=True)                       # (1, T)
    # NOTE: like the PyTorch module, an all-background pixel (all K faces
    # masked) gives denom == 0 and therefore NaN xyz; behavior preserved.
    inv_denom = pl.reciprocal(denom, approx=True)                   # EUP slot

    px = pts_ref[0]                                                 # (K, T)
    py = pts_ref[1]
    pz = pts_ref[2]
    out_ref[0:1, :] = jnp.sum(w * px, axis=0, keepdims=True) * inv_denom
    out_ref[1:2, :] = jnp.sum(w * py, axis=0, keepdims=True) * inv_denom
    out_ref[2:3, :] = jnp.sum(w * pz, axis=0, keepdims=True) * inv_denom
    out_ref[3:4, :] = 1.0 - alpha


def soft_mesh2image2pointcloud_shader(pix_to_face, dists, zbuf, points, *,
                                      sigma=1e-4, gamma=1e-4,
                                      znear=1.0, zfar=100.0, tile=16384):
    """Pallas equivalent of SoftMesh2Image2PointCloudShader.forward.

    pix_to_face: (N, H, W, K) int
    dists, zbuf: (N, H, W, K) float32
    points:      (N, H, W, K, 3) float32
    returns:     (N, W, 4) float32   (== merged_points[:, 0] in the reference)
    """
    # TODO(synk): tensor-valued (per-batch) znear/zfar are not supported; only
    # the module's default scalar path is implemented.
    N, H, W, K = pix_to_face.shape
    del H  # only merged_points[:, 0] is kept -> process the H == 0 slice.
    R = N * W

    # Slice H first, then lay pixels out on the lane axis (layout plumbing;
    # under jit these fuse into a single small copy per input).
    d_t = jnp.transpose(dists[:, 0].astype(jnp.float32).reshape(R, K))      # (K, R)
    z_t = jnp.transpose(zbuf[:, 0].astype(jnp.float32).reshape(R, K))       # (K, R)
    p_t = jnp.transpose(pix_to_face[:, 0].astype(jnp.int32).reshape(R, K))  # (K, R)
    pts_t = jnp.transpose(points[:, 0].astype(jnp.float32).reshape(R, K, 3),
                          (2, 1, 0))                                        # (3, K, R)

    # Lane padding: the row tile must be a multiple of 128 and divide padded R.
    lane = 128
    tile = max(lane, (int(tile) // lane) * lane)
    r_pad = ((R + lane - 1) // lane) * lane
    tile_eff = min(tile, r_pad)
    r_pad = ((r_pad + tile_eff - 1) // tile_eff) * tile_eff
    pad = r_pad - R
    if pad:
        d_t = jnp.pad(d_t, ((0, 0), (0, pad)))
        z_t = jnp.pad(z_t, ((0, 0), (0, pad)))
        p_t = jnp.pad(p_t, ((0, 0), (0, pad)), constant_values=-1)
        pts_t = jnp.pad(pts_t, ((0, 0), (0, 0), (0, pad)))

    kernel = functools.partial(
        _blend_kernel,
        neg_inv_sigma=-1.0 / float(sigma),
        inv_gamma=1.0 / float(gamma),
        z_scale=1.0 / (float(zfar) - float(znear)),
        zfar=float(zfar), K=K)

    face_spec = pl.BlockSpec((K, tile_eff), lambda i: (0, i))
    pts_spec = pl.BlockSpec((3, K, tile_eff), lambda i: (0, 0, i))
    out_spec = pl.BlockSpec((4, tile_eff), lambda i: (0, i))

    merged_t = pl.pallas_call(
        kernel,
        out_shape=jax.ShapeDtypeStruct((4, r_pad), jnp.float32),
        grid_spec=pltpu.PrefetchScalarGridSpec(
            num_scalar_prefetch=0,
            grid=(r_pad // tile_eff,),
            in_specs=[face_spec, face_spec, face_spec, pts_spec],
            out_specs=out_spec,
        ),
        compiler_params=pltpu.CompilerParams(
            dimension_semantics=("parallel",)),
    )(d_t, z_t, p_t, pts_t)

    merged = jnp.transpose(merged_t[:, :R]).reshape(N, W, 4)
    return merged                                                   # (N, W, 4)


def _reference_blend(pix_to_face, dists, zbuf, points,
                     sigma=1e-4, gamma=1e-4, znear=1.0, zfar=100.0):
    """Pure-JAX port of sigmoid_3dporjection_blend for verification."""
    eps = 1e-10
    mask = (pix_to_face >= 0).astype(jnp.float32)
    prob_map = jax.nn.sigmoid(-dists / sigma) * mask
    alpha = jnp.prod(1.0 - prob_map, axis=-1)
    z_inv = (zfar - zbuf) / (zfar - znear) * mask
    z_inv_max = jnp.maximum(jnp.max(z_inv, axis=-1, keepdims=True), eps)
    weights_num = prob_map * jnp.exp((z_inv - z_inv_max) / gamma)
    denom = jnp.sum(weights_num, axis=-1, keepdims=True)
    weighted_points = jnp.sum(weights_num[..., None] * points, axis=-2)
    merged = jnp.concatenate(
        [weighted_points / denom, (1.0 - alpha)[..., None]], axis=-1)
    return merged[:, 0]


if __name__ == "__main__":
    N, H, W, K = 2, 16, 16, 8
    key = jax.random.PRNGKey(0)
    k1, k2, k3, k4 = jax.random.split(key, 4)

    # dists on the order of sigma so the sigmoid is not fully saturated.
    dists = jax.random.uniform(k1, (N, H, W, K), jnp.float32,
                               minval=0.0, maxval=2e-4)
    zbuf = jax.random.uniform(k2, (N, H, W, K), jnp.float32,
                              minval=1.0, maxval=100.0)
    pix_to_face = jax.random.randint(k3, (N, H, W, K), -2, 50, jnp.int32)
    points = jax.random.normal(k4, (N, H, W, K, 3), jnp.float32)

    shader = jax.jit(soft_mesh2image2pointcloud_shader)
    out = jax.block_until_ready(shader(pix_to_face, dists, zbuf, points))
    ref = jax.block_until_ready(_reference_blend(pix_to_face, dists, zbuf,
                                                 points))

    assert out.shape == (N, W, 4) and out.dtype == jnp.float32
    # Tolerance accommodates the approximate EUP reciprocal and the folding of
    # 1/sigma, 1/gamma, 1/(zfar-znear) into multiply constants (gamma=1e-4
    # makes the exp weights sensitive to ~1-ulp reassociation differences).
    np.testing.assert_allclose(np.asarray(out), np.asarray(ref),
                               rtol=2e-2, atol=2e-2)
    print("KERNEL_OK")
</pallas_src>

<mosaic_0001>
module attributes {stable_mosaic.version = 11 : i64} {
  func.func @_blend_kernel(%arg0: i32, %arg1: memref<8x128xf32, #tpu.memory_space<vmem>>, %arg2: memref<8x128xf32, #tpu.memory_space<vmem>>, %arg3: memref<8x128xi32, #tpu.memory_space<vmem>>, %arg4: memref<3x8x128xf32, #tpu.memory_space<vmem>>, %arg5: memref<4x128xf32, #tpu.memory_space<vmem>>) attributes {dimension_semantics = [#tpu.dimension_semantics<parallel>], iteration_bounds = array<i64: 1>, scalar_prefetch = 0 : i64, scratch_operands = 0 : i64, tpu.core_type = #tpu.core_type<tc>, window_params = [{transform_indices = @transform_0, window_bounds = array<i64: 8, 128>}, {transform_indices = @transform_1, window_bounds = array<i64: 8, 128>}, {transform_indices = @transform_2, window_bounds = array<i64: 8, 128>}, {transform_indices = @transform_3, window_bounds = array<i64: 3, 8, 128>}, {transform_indices = @transform_4, window_bounds = array<i64: 4, 128>}]} {
    %c0 = arith.constant 0 : index
    %c0_0 = arith.constant 0 : index
    %0 = vector.load %arg3[%c0, %c0_0] : memref<8x128xi32, #tpu.memory_space<vmem>>, vector<8x128xi32>
    %c0_i32 = arith.constant 0 : i32
    %1 = vector.broadcast %c0_i32 : i32 to vector<8x128xi32>
    %2 = arith.cmpi sge, %0, %1 : vector<8x128xi32>
    %3 = arith.extui %2 : vector<8x128xi1> to vector<8x128xi32>
    %4 = arith.sitofp %3 : vector<8x128xi32> to vector<8x128xf32>
    %c0_1 = arith.constant 0 : index
    %c0_2 = arith.constant 0 : index
    %5 = vector.load %arg1[%c0_1, %c0_2] : memref<8x128xf32, #tpu.memory_space<vmem>>, vector<8x128xf32>
    %cst = arith.constant -1.000000e+04 : f32
    %6 = vector.broadcast %cst : f32 to vector<8x128xf32>
    %7 = arith.mulf %5, %6 : vector<8x128xf32>
    %8 = arith.negf %7 : vector<8x128xf32>
    %9 = math.exp %8 : vector<8x128xf32>
    %cst_3 = arith.constant 1.000000e+00 : f32
    %10 = vector.broadcast %cst_3 : f32 to vector<8x128xf32>
    %11 = arith.addf %10, %9 : vector<8x128xf32>
    %12 = arith.divf %10, %11 : vector<8x128xf32>
    %13 = arith.mulf %12, %4 : vector<8x128xf32>
    %cst_4 = arith.constant 1.000000e+00 : f32
    %14 = vector.broadcast %cst_4 : f32 to vector<8x128xf32>
    %15 = arith.subf %14, %13 : vector<8x128xf32>
    %16 = vector.extract_strided_slice %15 {offsets = [0, 0], sizes = [1, 128], strides = [1, 1]} : vector<8x128xf32> to vector<1x128xf32>
    %17 = vector.extract_strided_slice %15 {offsets = [1, 0], sizes = [1, 128], strides = [1, 1]} : vector<8x128xf32> to vector<1x128xf32>
    %18 = arith.mulf %16, %17 : vector<1x128xf32>
    %19 = vector.extract_strided_slice %15 {offsets = [2, 0], sizes = [1, 128], strides = [1, 1]} : vector<8x128xf32> to vector<1x128xf32>
    %20 = arith.mulf %18, %19 : vector<1x128xf32>
    %21 = vector.extract_strided_slice %15 {offsets = [3, 0], sizes = [1, 128], strides = [1, 1]} : vector<8x128xf32> to vector<1x128xf32>
    %22 = arith.mulf %20, %21 : vector<1x128xf32>
    %23 = vector.extract_strided_slice %15 {offsets = [4, 0], sizes = [1, 128], strides = [1, 1]} : vector<8x128xf32> to vector<1x128xf32>
    %24 = arith.mulf %22, %23 : vector<1x128xf32>
    %25 = vector.extract_strided_slice %15 {offsets = [5, 0], sizes = [1, 128], strides = [1, 1]} : vector<8x128xf32> to vector<1x128xf32>
    %26 = arith.mulf %24, %25 : vector<1x128xf32>
    %27 = vector.extract_strided_slice %15 {offsets = [6, 0], sizes = [1, 128], strides = [1, 1]} : vector<8x128xf32> to vector<1x128xf32>
    %28 = arith.mulf %26, %27 : vector<1x128xf32>
    %29 = vector.extract_strided_slice %15 {offsets = [7, 0], sizes = [1, 128], strides = [1, 1]} : vector<8x128xf32> to vector<1x128xf32>
    %30 = arith.mulf %28, %29 : vector<1x128xf32>
    %c0_5 = arith.constant 0 : index
    %c0_6 = arith.constant 0 : index
    %31 = vector.load %arg2[%c0_5, %c0_6] : memref<8x128xf32, #tpu.memory_space<vmem>>, vector<8x128xf32>
    %cst_7 = arith.constant 1.000000e+02 : f32
    %32 = vector.broadcast %cst_7 : f32 to vector<8x128xf32>
    %33 = arith.subf %32, %31 : vector<8x128xf32>
    %cst_8 = arith.constant 0.0101010101 : f32
    %34 = vector.broadcast %cst_8 : f32 to vector<8x128xf32>
    %35 = arith.mulf %33, %34 : vector<8x128xf32>
    %36 = arith.mulf %35, %4 : vector<8x128xf32>
    %cst_9 = arith.constant dense<0xFF800000> : vector<128xf32>
    %37 = vector.multi_reduction <maximumf>, %36, %cst_9 [0] : vector<8x128xf32> to vector<128xf32>
    %38 = vector.shape_cast %37 : vector<128xf32> to vector<1x128xf32>
    %cst_10 = arith.constant 1.000000e-10 : f32
    %39 = vector.broadcast %cst_10 : f32 to vector<1x128xf32>
    %40 = arith.maximumf %38, %39 : vector<1x128xf32>
    %41 = vector.broadcast %40 : vector<1x128xf32> to vector<8x128xf32>
    %42 = arith.subf %36, %41 : vector<8x128xf32>
    %cst_11 = arith.constant 1.000000e+04 : f32
    %43 = vector.broadcast %cst_11 : f32 to vector<8x128xf32>
    %44 = arith.mulf %42, %43 : vector<8x128xf32>
    %45 = math.exp %44 : vector<8x128xf32>
    %46 = arith.mulf %13, %45 : vector<8x128xf32>
    %cst_12 = arith.constant dense<0.000000e+00> : vector<128xf32>
    %47 = vector.multi_reduction <add>, %46, %cst_12 [0] : vector<8x128xf32> to vector<128xf32>
    %48 = vector.shape_cast %47 : vector<128xf32> to vector<1x128xf32>
    %49 = tpu.reciprocal %48 {approx = true} : vector<1x128xf32> -> vector<1x128xf32>
    %c0_13 = arith.constant 0 : index
    %c0_14 = arith.constant 0 : index
    %c0_15 = arith.constant 0 : index
    %50 = vector.load %arg4[%c0_13, %c0_14, %c0_15] : memref<3x8x128xf32, #tpu.memory_space<vmem>>, vector<1x8x128xf32>
    %51 = vector.shape_cast %50 : vector<1x8x128xf32> to vector<8x128xf32>
    %c1 = arith.constant 1 : index
    %c0_16 = arith.constant 0 : index
    %c0_17 = arith.constant 0 : index
    %52 = vector.load %arg4[%c1, %c0_16, %c0_17] : memref<3x8x128xf32, #tpu.memory_space<vmem>>, vector<1x8x128xf32>
    %53 = vector.shape_cast %52 : vector<1x8x128xf32> to vector<8x128xf32>
    %c2 = arith.constant 2 : index
    %c0_18 = arith.constant 0 : index
    %c0_19 = arith.constant 0 : index
    %54 = vector.load %arg4[%c2, %c0_18, %c0_19] : memref<3x8x128xf32, #tpu.memory_space<vmem>>, vector<1x8x128xf32>
    %55 = vector.shape_cast %54 : vector<1x8x128xf32> to vector<8x128xf32>
    %56 = arith.mulf %46, %51 : vector<8x128xf32>
    %cst_20 = arith.constant dense<0.000000e+00> : vector<128xf32>
    %57 = vector.multi_reduction <add>, %56, %cst_20 [0] : vector<8x128xf32> to vector<128xf32>
    %58 = vector.shape_cast %57 : vector<128xf32> to vector<1x128xf32>
    %59 = arith.mulf %58, %49 : vector<1x128xf32>
    %c0_21 = arith.constant 0 : index
    %c0_22 = arith.constant 0 : index
    %60 = vector.load %arg5[%c0_21, %c0_22] : memref<4x128xf32, #tpu.memory_space<vmem>>, vector<1x128xf32>
    tpu.vector_store %arg5[%c0_21, %c0_22], %59 {strides = array<i32>} : memref<4x128xf32, #tpu.memory_space<vmem>>, vector<1x128xf32>,
    %61 = arith.mulf %46, %53 : vector<8x128xf32>
    %cst_23 = arith.constant dense<0.000000e+00> : vector<128xf32>
    %62 = vector.multi_reduction <add>, %61, %cst_23 [0] : vector<8x128xf32> to vector<128xf32>
    %63 = vector.shape_cast %62 : vector<128xf32> to vector<1x128xf32>
    %64 = arith.mulf %63, %49 : vector<1x128xf32>
    %c1_24 = arith.constant 1 : index
    %c0_25 = arith.constant 0 : index
    %65 = vector.load %arg5[%c1_24, %c0_25] : memref<4x128xf32, #tpu.memory_space<vmem>>, vector<1x128xf32>
    tpu.vector_store %arg5[%c1_24, %c0_25], %64 {strides = array<i32>} : memref<4x128xf32, #tpu.memory_space<vmem>>, vector<1x128xf32>,
    %66 = arith.mulf %46, %55 : vector<8x128xf32>
    %cst_26 = arith.constant dense<0.000000e+00> : vector<128xf32>
    %67 = vector.multi_reduction <add>, %66, %cst_26 [0] : vector<8x128xf32> to vector<128xf32>
    %68 = vector.shape_cast %67 : vector<128xf32> to vector<1x128xf32>
    %69 = arith.mulf %68, %49 : vector<1x128xf32>
    %c2_27 = arith.constant 2 : index
    %c0_28 = arith.constant 0 : index
    %70 = vector.load %arg5[%c2_27, %c0_28] : memref<4x128xf32, #tpu.memory_space<vmem>>, vector<1x128xf32>
    tpu.vector_store %arg5[%c2_27, %c0_28], %69 {strides = array<i32>} : memref<4x128xf32, #tpu.memory_space<vmem>>, vector<1x128xf32>,
    %cst_29 = arith.constant 1.000000e+00 : f32
    %71 = vector.broadcast %cst_29 : f32 to vector<1x128xf32>
    %72 = arith.subf %71, %30 : vector<1x128xf32>
    %c3 = arith.constant 3 : index
    %c0_30 = arith.constant 0 : index
    %73 = vector.load %arg5[%c3, %c0_30] : memref<4x128xf32, #tpu.memory_space<vmem>>, vector<1x128xf32>
    tpu.vector_store %arg5[%c3, %c0_30], %72 {strides = array<i32>} : memref<4x128xf32, #tpu.memory_space<vmem>>, vector<1x128xf32>,
    return
  }
  func.func @transform_0(%arg0: i32) -> (i32, i32) {
    %c0_i32 = arith.constant 0 : i32
    %c0_i32_0 = arith.constant 0 : i32
    return %c0_i32, %arg0 : i32, i32
  }
  func.func @transform_1(%arg0: i32) -> (i32, i32) {
    %c0_i32 = arith.constant 0 : i32
    %c0_i32_0 = arith.constant 0 : i32
    return %c0_i32, %arg0 : i32, i32
  }
  func.func @transform_2(%arg0: i32) -> (i32, i32) {
    %c0_i32 = arith.constant 0 : i32
    %c0_i32_0 = arith.constant 0 : i32
    return %c0_i32, %arg0 : i32, i32
  }
  func.func @transform_3(%arg0: i32) -> (i32, i32, i32) {
    %c0_i32 = arith.constant 0 : i32
    %c0_i32_0 = arith.constant 0 : i32
    %c0_i32_1 = arith.constant 0 : i32
    return %c0_i32, %c0_i32_0, %arg0 : i32, i32, i32
  }
  func.func @transform_4(%arg0: i32) -> (i32, i32) {
    %c0_i32 = arith.constant 0 : i32
    %c0_i32_0 = arith.constant 0 : i32
    return %c0_i32, %arg0 : i32, i32
  }
}

</mosaic_0001>

<bundles_post_ra>
// kernel: squeeze.7
= control target key start
LH: loop header
LB: loop body
LE: loop exit
PB: predicated region body
PF: predicated region fallthrough
CT: control target
= control target key end

     0   :  { %vm122_vm0 = vcmask 1047556   ;;  %vm124_vm1 = vcmask 130048   ;;  %vm152_vm2 = vcmask 261248   ;;  %s336_s0 = inlined_call_operand.vmem [shape: f32[2,1,16,8,3], index: 0, kind: input, shape index: {}]   ;;  %s337_s1 = inlined_call_operand.vmem [shape: f32[32,8,3], index: 1, kind: output, shape index: {}]  }
   0x1   :  { %v214_v0 = vld [vmem:[%s336_s0 + $0xe] sm:$0x3]  ;;  %v215_v1 = vld [vmem:[%s336_s0 + $0xc] sm:$0x3]  ;;  %v216_v2 = vld [vmem:[%s336_s0 + $0xa] sm:$0x3] }
   0x2   :  { %88 = vst [vmem:[#allocation0 + $0x38] sm:$0x3] %v214_v0  ;;  %93 = vst [vmem:[#allocation0 + $0x30] sm:$0x3] %v215_v1  ;;  %v217_v3 = vld [vmem:[%s336_s0 + $0x8] sm:$0x3] }
   0x3   :  { %98 = vst [vmem:[#allocation0 + $0x28] sm:$0x3] %v216_v2  ;;  %v218_v4 = vld [vmem:[%s336_s0 + $0x6] sm:$0x3]  ;;  %v219_v5 = vld [vmem:[%s336_s0 + $0x4] sm:$0x3] }
   0x4   :  { %103 = vst [vmem:[#allocation0 + $0x20] sm:$0x3] %v217_v3  ;;  %108 = vst [vmem:[#allocation0 + $0x18] sm:$0x3] %v218_v4  ;;  %v220_v6 = vld [vmem:[%s336_s0 + $0x2] sm:$0x3] }
   0x5   :  { %113 = vst [vmem:[#allocation0 + $0x10] sm:$0x3] %v219_v5  ;;  %v118_v7 = vld [vmem:[%s336_s0] sm:$0x3]  ;;  %117 = vst [vmem:[#allocation0 + $0x8] sm:$0x3] %v220_v6 }
   0x6   :  { %119 = vst [vmem:[#allocation0] sm:$0x3] %v118_v7  ;;  %v206_v8 = vld [vmem:[%s336_s0 + $0x1e] sm:$0x3]  ;;  %v207_v9 = vld [vmem:[%s336_s0 + $0x1c] sm:$0x3] }
   0x7   :  { %v208_v10 = vld [vmem:[%s336_s0 + $0x1a] sm:$0x3]  ;;  %48 = vst [vmem:[#allocation0 + $0x78] sm:$0x3] %v206_v8  ;;  %53 = vst [vmem:[#allocation0 + $0x70] sm:$0x3] %v207_v9 }
   0x8   :  { %58 = vst [vmem:[#allocation0 + $0x68] sm:$0x3] %v208_v10  ;;  %v209_v11 = vld [vmem:[%s336_s0 + $0x18] sm:$0x3]  ;;  %v210_v12 = vld [vmem:[%s336_s0 + $0x16] sm:$0x3] }
   0x9   :  { %v211_v13 = vld [vmem:[%s336_s0 + $0x14] sm:$0x3]  ;;  %63 = vst [vmem:[#allocation0 + $0x60] sm:$0x3] %v209_v11  ;;  %68 = vst [vmem:[#allocation0 + $0x58] sm:$0x3] %v210_v12 }
   0xa   :  { %73 = vst [vmem:[#allocation0 + $0x50] sm:$0x3] %v211_v13  ;;  %v212_v14 = vld [vmem:[%s336_s0 + $0x12] sm:$0x3]  ;;  %v213_v15 = vld [vmem:[%s336_s0 + $0x10] sm:$0x3] }
   0xb   :  { %v198_v16 = vld [vmem:[%s336_s0 + $0x2e] sm:$0x3]  ;;  %78 = vst [vmem:[#allocation0 + $0x48] sm:$0x3] %v212_v14  ;;  %83 = vst [vmem:[#allocation0 + $0x40] sm:$0x3] %v213_v15 }
   0xc   :  { %8 = vst [vmem:[#allocation0 + $0xb8] sm:$0x3] %v198_v16  ;;  %v199_v17 = vld [vmem:[%s336_s0 + $0x2c] sm:$0x3]  ;;  %v200_v18 = vld [vmem:[%s336_s0 + $0x2a] sm:$0x3] }
   0xd   :  { %v201_v19 = vld [vmem:[%s336_s0 + $0x28] sm:$0x3]  ;;  %13 = vst [vmem:[#allocation0 + $0xb0] sm:$0x3] %v199_v17  ;;  %18 = vst [vmem:[#allocation0 + $0xa8] sm:$0x3] %v200_v18 }
   0xe   :  { %23 = vst [vmem:[#allocation0 + $0xa0] sm:$0x3] %v201_v19  ;;  %v202_v20 = vld [vmem:[%s336_s0 + $0x26] sm:$0x3]  ;;  %v203_v21 = vld [vmem:[%s336_s0 + $0x24] sm:$0x3] }
   0xf   :  { %v204_v22 = vld [vmem:[%s336_s0 + $0x22] sm:$0x3]  ;;  %28 = vst [vmem:[#allocation0 + $0x98] sm:$0x3] %v202_v20  ;;  %33 = vst [vmem:[#allocation0 + $0x90] sm:$0x3] %v203_v21 }
  0x10   :  { %38 = vst [vmem:[#allocation0 + $0x88] sm:$0x3] %v204_v22  ;;  %v205_v23 = vld [vmem:[%s336_s0 + $0x20] sm:$0x3]  ;;  %s226_s0 = smov 16  }
  0x11   :  { %v147_v24 = vld [vmem:[#allocation0 + $0x1] ss:$8 sm:$0xf0]   ;;  %43 = vst [vmem:[#allocation0 + $0x80] sm:$0x3] %v205_v23 }
  0x12   :  { %v121_v25 = vld [vmem:[#allocation0] ss:$8 sm:$0xf0]   ;;  %v145_v26 = vld [vmem:[#allocation0 + $0x1] ss:$8 sm:$0xf]  }
  0x13   :  { %v120_v27 = vld [vmem:[#allocation0] ss:$8 sm:$0xf]   ;;  %v149_v28 = vsel %vm122_vm0, %v147_v24, %v145_v26  ;;  %v157_v30 = vld [vmem:[#allocation0 + $0x41] ss:$8 sm:$0xf0]  }
  0x14   :  { %v123_v29 = vsel %vm122_vm0, %v121_v25, %v120_v27  ;;  %150 = vrot.lane.b32.xlu0 %v149_v28, %s226_s0  ;;  %v129_v31 = vld [vmem:[#allocation0 + $0x40] ss:$8 sm:$0xf0]   ;;  %v155_v32 = vld [vmem:[#allocation0 + $0x41] ss:$8 sm:$0xf]  }
  0x15   :  { %125 = vst.msk [vmem:[%s337_s1] sm:$0xff] %vm124_vm1, %v123_v29   ;;  %v127_v33 = vld [vmem:[#allocation0 + $0x40] ss:$8 sm:$0xf]   ;;  %v159_v34 = vsel %vm122_vm0, %v157_v30, %v155_v32 }
  0x16   :  { %v168_v35 = vld [vmem:[#allocation0 + $0x81] ss:$8 sm:$0xf0]   ;;  %v131_v36 = vsel %vm122_vm0, %v129_v31, %v127_v33  ;;  %v138_v37 = vld [vmem:[#allocation0 + $0x80] ss:$8 sm:$0xf0]  }
  0x17   :  { %221 = vst.msk [vmem:[%s337_s1 + $0x8] sm:$0xff] %vm124_vm1, %v131_v36  }
  0x18   :  { %160 = vrot.lane.b32.xlu0 %v159_v34, %s226_s0  ;;  %v166_v38 = vld [vmem:[#allocation0 + $0x81] ss:$8 sm:$0xf]   ;;  %v136_v39 = vld [vmem:[#allocation0 + $0x80] ss:$8 sm:$0xf]  }
  0x19   :  { %v170_v40 = vsel %vm122_vm0, %v168_v35, %v166_v38  ;;  %v140_v41 = vsel %vm122_vm0, %v138_v37, %v136_v39 }
  0x1a   :  { %171 = vrot.lane.b32.xlu1 %v170_v40, %s226_s0  ;;  %222 = vst.msk [vmem:[%s337_s1 + $0x10] sm:$0xff] %vm124_vm1, %v140_v41  }
  0x86   :  { %v151_v42 = vpop.permute.xlu0 %150  }
  0x87   :  { %153 = vst.msk [vmem:[%s337_s1] sm:$0xff] %vm152_vm2, %v151_v42  }
  0x8a   :  { %v161_v43 = vpop.permute.xlu0 %160  }
  0x8b   :  { %223 = vst.msk [vmem:[%s337_s1 + $0x8] sm:$0xff] %vm152_vm2, %v161_v43  }
  0x8c   :  { %v172_v44 = vpop.permute.xlu1 %171  }
  0x8d   :  { %224 = vst.msk [vmem:[%s337_s1 + $0x10] sm:$0xff] %vm152_vm2, %v172_v44  }

// kernel: squeeze.4
= control target key start
LH: loop header
LB: loop body
LE: loop exit
PB: predicated region body
PF: predicated region fallthrough
CT: control target
= control target key end

     0   :  { %vm42_vm0 = vcmask 1047556   ;;  %vm44_vm1 = vcmask 130048   ;;  %vm54_vm2 = vcmask 261248   ;;  %s111_s0 = inlined_call_operand.vmem [shape: f32[2,1,16,8], index: 0, kind: input, shape index: {}]   ;;  %s112_s1 = inlined_call_operand.vmem [shape: f32[32,8], index: 1, kind: output, shape index: {}]  }
   0x1   :  { %v62_v0 = vld [vmem:[%s111_s0 + $0xe] sm:$0x3]  ;;  %v63_v1 = vld [vmem:[%s111_s0 + $0xc] sm:$0x3]  ;;  %v64_v2 = vld [vmem:[%s111_s0 + $0xa] sm:$0x3] }
   0x2   :  { %8 = vst [vmem:[#allocation0 + $0x38] sm:$0x3] %v62_v0  ;;  %13 = vst [vmem:[#allocation0 + $0x30] sm:$0x3] %v63_v1  ;;  %v65_v3 = vld [vmem:[%s111_s0 + $0x8] sm:$0x3] }
   0x3   :  { %18 = vst [vmem:[#allocation0 + $0x28] sm:$0x3] %v64_v2  ;;  %v66_v4 = vld [vmem:[%s111_s0 + $0x6] sm:$0x3]  ;;  %v67_v5 = vld [vmem:[%s111_s0 + $0x4] sm:$0x3] }
   0x4   :  { %23 = vst [vmem:[#allocation0 + $0x20] sm:$0x3] %v65_v3  ;;  %28 = vst [vmem:[#allocation0 + $0x18] sm:$0x3] %v66_v4  ;;  %v68_v6 = vld [vmem:[%s111_s0 + $0x2] sm:$0x3] }
   0x5   :  { %33 = vst [vmem:[#allocation0 + $0x10] sm:$0x3] %v67_v5  ;;  %v38_v7 = vld [vmem:[%s111_s0] sm:$0x3]  ;;  %37 = vst [vmem:[#allocation0 + $0x8] sm:$0x3] %v68_v6 }
   0x6   :  { %39 = vst [vmem:[#allocation0] sm:$0x3] %v38_v7  ;;  %s70_s0 = smov 16  }
   0xb   :  { %v41_v8 = vld [vmem:[#allocation0] ss:$8 sm:$0xf0]   ;;  %v49_v9 = vld [vmem:[#allocation0 + $0x1] ss:$8 sm:$0xf0]  }
   0xd   :  { %v40_v10 = vld [vmem:[#allocation0] ss:$8 sm:$0xf]   ;;  %v47_v11 = vld [vmem:[#allocation0 + $0x1] ss:$8 sm:$0xf]  }
   0xe   :  { %v43_v12 = vsel %vm42_vm0, %v41_v8, %v40_v10  ;;  %v51_v13 = vsel %vm42_vm0, %v49_v9, %v47_v11 }
   0xf   :  { %52 = vrot.lane.b32.xlu0 %v51_v13, %s70_s0  ;;  %45 = vst.msk [vmem:[%s112_s1] sm:$0xff] %vm44_vm1, %v43_v12  }
  0x81   :  { %v53_v14 = vpop.permute.xlu0 %52  }
  0x82   :  { %55 = vst.msk [vmem:[%s112_s1] sm:$0xff] %vm54_vm2, %v53_v14  }

// kernel: squeeze.6
= control target key start
LH: loop header
LB: loop body
LE: loop exit
PB: predicated region body
PF: predicated region fallthrough
CT: control target
= control target key end

     0   :  { %vm42_vm0 = vcmask 1047556   ;;  %vm44_vm1 = vcmask 130048   ;;  %vm54_vm2 = vcmask 261248   ;;  %s111_s0 = inlined_call_operand.vmem [shape: s32[2,1,16,8], index: 0, kind: input, shape index: {}]   ;;  %s112_s1 = inlined_call_operand.vmem [shape: s32[32,8], index: 1, kind: output, shape index: {}]  }
   0x1   :  { %v62_v0 = vld [vmem:[%s111_s0 + $0xe] sm:$0x3]  ;;  %v63_v1 = vld [vmem:[%s111_s0 + $0xc] sm:$0x3]  ;;  %v64_v2 = vld [vmem:[%s111_s0 + $0xa] sm:$0x3] }
   0x2   :  { %8 = vst [vmem:[#allocation0 + $0x38] sm:$0x3] %v62_v0  ;;  %13 = vst [vmem:[#allocation0 + $0x30] sm:$0x3] %v63_v1  ;;  %v65_v3 = vld [vmem:[%s111_s0 + $0x8] sm:$0x3] }
   0x3   :  { %18 = vst [vmem:[#allocation0 + $0x28] sm:$0x3] %v64_v2  ;;  %v66_v4 = vld [vmem:[%s111_s0 + $0x6] sm:$0x3]  ;;  %v67_v5 = vld [vmem:[%s111_s0 + $0x4] sm:$0x3] }
   0x4   :  { %23 = vst [vmem:[#allocation0 + $0x20] sm:$0x3] %v65_v3  ;;  %28 = vst [vmem:[#allocation0 + $0x18] sm:$0x3] %v66_v4  ;;  %v68_v6 = vld [vmem:[%s111_s0 + $0x2] sm:$0x3] }
   0x5   :  { %33 = vst [vmem:[#allocation0 + $0x10] sm:$0x3] %v67_v5  ;;  %v38_v7 = vld [vmem:[%s111_s0] sm:$0x3]  ;;  %37 = vst [vmem:[#allocation0 + $0x8] sm:$0x3] %v68_v6 }
   0x6   :  { %39 = vst [vmem:[#allocation0] sm:$0x3] %v38_v7  ;;  %s70_s0 = smov 16  }
   0xb   :  { %v41_v8 = vld [vmem:[#allocation0] ss:$8 sm:$0xf0]   ;;  %v49_v9 = vld [vmem:[#allocation0 + $0x1] ss:$8 sm:$0xf0]  }
   0xd   :  { %v40_v10 = vld [vmem:[#allocation0] ss:$8 sm:$0xf]   ;;  %v47_v11 = vld [vmem:[#allocation0 + $0x1] ss:$8 sm:$0xf]  }
   0xe   :  { %v43_v12 = vsel %vm42_vm0, %v41_v8, %v40_v10  ;;  %v51_v13 = vsel %vm42_vm0, %v49_v9, %v47_v11 }
   0xf   :  { %52 = vrot.lane.b32.xlu0 %v51_v13, %s70_s0  ;;  %45 = vst.msk [vmem:[%s112_s1] sm:$0xff] %vm44_vm1, %v43_v12  }
  0x81   :  { %v53_v14 = vpop.permute.xlu0 %52  }
  0x82   :  { %55 = vst.msk [vmem:[%s112_s1] sm:$0xff] %vm54_vm2, %v53_v14  }

// kernel: soft_mesh2image2pointcloud_shader.1
= control target key start
LH: loop header
LB: loop body
LE: loop exit
PB: predicated region body
PF: predicated region fallthrough
CT: control target
= control target key end

     0   :  { %v127_v5 = vmov 0.0   ;;  %s183_s0 = inlined_call_operand.vmem [shape: f32[8,128], index: 0, kind: input, shape index: {}]   ;;  %s184_s1 = inlined_call_operand.vmem [shape: f32[8,128], index: 1, kind: input, shape index: {}]   ;;  %s185_s2 = inlined_call_operand.vmem [shape: s32[8,128], index: 2, kind: input, shape index: {}]   ;;  %s186_s3 = inlined_call_operand.vmem [shape: f32[3,8,128], index: 3, kind: input, shape index: {}]   ;;  %s187_s4 = inlined_call_operand.vmem [shape: f32[4,128], index: 4, kind: output, shape index: {}]  }
   0x1   :  { %v17_v0 = vld [vmem:[%s185_s2] sm:$0xff]  ;;  %v116_v31 = vld [vmem:[%s186_s3 + $0x8] sm:$0xff]  ;;  %v117_v32 = vld [vmem:[%s186_s3 + $0x10] sm:$0xff] }
   0x2   :  { %v21_v1 = vld [vmem:[%s183_s0] sm:$0xff]  ;;  %vm18_vm0 = vcmp.ge.s32.totalorder %v17_v0, 0 }
   0x3   :  { %v53_v2 = vld [vmem:[%s184_s1] sm:$0xff]  ;;  %v115_v3 = vmul.f32 10000.0, %v21_v1  ;;  %v114_v6 = vsel %vm18_vm0, 1.0, %v127_v5 }
   0x4   :  { %v54_v4 = vsub.f32 100.0, %v53_v2  ;;  %v76_v30 = vld [vmem:[%s186_s3] sm:$0xff] }
   0x5   :  { %v24_v7 = vmul.f32 1.442695, %v115_v3 }
   0x6   :  { %v55_v8 = vmul.f32 0.01010101, %v54_v4 }
   0x7   :  { %119 = vpow2.f32 %v24_v7 }
   0x8   :  { %v56_v9 = vmul.f32 %v114_v6, %v55_v8 }
   0xa   :  { %v57_v10 = vrot.slane %v56_v9, 4 }
   0xc   :  { %v58_v11 = vmax.f32 %v56_v9, %v57_v10 }
   0xe   :  { %v59_v12 = vrot.slane %v58_v11, 2 }
  0x10   :  { %v60_v13 = vmax.f32 %v58_v11, %v59_v12 }
  0x11   :  { %v120_v14 = vpop.eup %119 }
  0x12   :  { %v61_v15 = vrot.slane %v60_v13, 1  ;;  %v26_v16 = vadd.f32 1.0, %v120_v14 }
  0x14   :  { %v62_v17 = vmax.f32 %v60_v13, %v61_v15  ;;  %121 = vrcp.f32 %v26_v16 }
  0x16   :  { %v63_v18 = vmax.f32 %v62_v17, 1e-10 }
  0x18   :  { %v64_v19 = vsub.f32 %v56_v9, %v63_v18 }
  0x1a   :  { %v65_v20 = vmul.f32 10000.0, %v64_v19 }
  0x1c   :  { %v66_v21 = vmul.f32 1.442695, %v65_v20 }
  0x1e   :  { %123 = vpow2.f32 %v66_v21  ;;  %v122_v22 = vpop.eup %121 }
  0x1f   :  { %v29_v23 = vmul.f32 %v122_v22, %v114_v6 }
  0x21   :  { %v30_v24 = vsub.f32 1.0, %v29_v23 }
  0x23   :  { %v32_v25 = vrot.slane %v30_v24, 1  ;;  %v35_v26 = vrot.slane %v30_v24, 2  ;;  %v38_v28 = vrot.slane %v30_v24, 3  ;;  %v41_v34 = vrot.slane %v30_v24, 4 }
  0x24   :  { %v44_v37 = vrot.slane %v30_v24, 5  ;;  %v47_v43 = vrot.slane %v30_v24, 6  ;;  %v50_v49 = vrot.slane %v30_v24, 7 }
  0x25   :  { %v34_v27 = vmul.f32 %v32_v25, %v30_v24 }
  0x27   :  { %v37_v33 = vmul.f32 %v35_v26, %v34_v27 }
  0x28   :  { %v124_v29 = vpop.eup %123 }
  0x29   :  { %v68_v35 = vmul.f32 %v124_v29, %v29_v23  ;;  %v40_v36 = vmul.f32 %v38_v28, %v37_v33 }
  0x2b   :  { %v69_v38 = vrot.slane %v68_v35, 4  ;;  %v81_v39 = vmul.f32 %v76_v30, %v68_v35  ;;  %v90_v40 = vmul.f32 %v116_v31, %v68_v35  ;;  %v99_v41 = vmul.f32 %v117_v32, %v68_v35 }
  0x2c   :  { %v43_v42 = vmul.f32 %v41_v34, %v40_v36 }
  0x2d   :  { %v70_v44 = vadd.f32 %v69_v38, %v68_v35  ;;  %v82_v45 = vrot.slane %v81_v39, 4  ;;  %v91_v46 = vrot.slane %v90_v40, 4  ;;  %v100_v47 = vrot.slane %v99_v41, 4 }
  0x2e   :  { %v46_v48 = vmul.f32 %v44_v37, %v43_v42 }
  0x2f   :  { %v71_v50 = vrot.slane %v70_v44, 2  ;;  %v83_v51 = vadd.f32 %v82_v45, %v81_v39  ;;  %v92_v52 = vadd.f32 %v91_v46, %v90_v40  ;;  %v101_v53 = vadd.f32 %v100_v47, %v99_v41 }
  0x30   :  { %v49_v54 = vmul.f32 %v47_v43, %v46_v48 }
  0x31   :  { %v72_v55 = vadd.f32 %v71_v50, %v70_v44  ;;  %v84_v56 = vrot.slane %v83_v51, 2  ;;  %v93_v57 = vrot.slane %v92_v52, 2  ;;  %v102_v58 = vrot.slane %v101_v53, 2 }
  0x32   :  { %v52_v59 = vmul.f32 %v50_v49, %v49_v54 }
  0x33   :  { %v73_v60 = vrot.slane %v72_v55, 1  ;;  %v85_v63 = vadd.f32 %v84_v56, %v83_v51  ;;  %v94_v0 = vadd.f32 %v93_v57, %v92_v52  ;;  %v103_v1 = vadd.f32 %v102_v58, %v101_v53 }
  0x34   :  { %v108_v61 = vsub.f32 1.0, %v52_v59 }
  0x35   :  { %v74_v62 = vadd.f32 %v73_v60, %v72_v55  ;;  %v86_v2 = vrot.slane %v85_v63, 1  ;;  %v95_v3 = vrot.slane %v94_v0, 1  ;;  %v104_v4 = vrot.slane %v103_v1, 1 }
  0x36   :  { %109 = vst [vmem:[%s187_s4 + $0x3] sm:$0x1] %v108_v61 }
  0x37   :  { %125 = vrcp.f32 %v74_v62  ;;  %v87_v5 = vadd.f32 %v86_v2, %v85_v63  ;;  %v96_v6 = vadd.f32 %v95_v3, %v94_v0  ;;  %v105_v7 = vadd.f32 %v104_v4, %v103_v1 }
  0x41   :  { %v126_v8 = vpop.eup %125 }
  0x42   :  { %v88_v9 = vmul.f32 %v126_v8, %v87_v5  ;;  %v97_v10 = vmul.f32 %v126_v8, %v96_v6  ;;  %v106_v11 = vmul.f32 %v126_v8, %v105_v7 }
  0x44   :  { %89 = vst [vmem:[%s187_s4] sm:$0x1] %v88_v9  ;;  %98 = vst [vmem:[%s187_s4 + $0x1] sm:$0x1] %v97_v10 }
  0x45   :  { %107 = vst [vmem:[%s187_s4 + $0x2] sm:$0x1] %v106_v11 }

</bundles_post_ra>
